<compile_context>
chip_gen: v7x
topology: tpu7x:2x2x1
jax: 0.10.0
libtpu: 0.0.40
codegen_flags: <defaults>
</compile_context>

<pallas_src>
import functools
import math

import jax
import jax.numpy as jnp
from jax.experimental import pallas as pl
from jax.experimental.pallas import tpu as pltpu


def _round_up(n, m):
    return ((n + m - 1) // m) * m


def _mlp_kernel(x_ref, w1_ref, b1_ref, w2t_ref, b2c_ref, w3c_ref, b3_ref,
                o_ref, *, mxu_bf16):
    """One batch tile: fc1 (MXU, batch-on-sublanes) -> aligned transpose ->
    fc2 (MXU, batch-on-lanes) -> fc3 (VPU mul + sublane reduce) -> sigmoid
    (EUP) -> lane-dense store."""
    x = x_ref[...]                           # [tb, D]
    w1 = w1_ref[...]                         # [D, H1]
    if mxu_bf16:
        x = x.astype(jnp.bfloat16)
        w1 = w1.astype(jnp.bfloat16)

    # fc1 + ReLU (MXU), batch on sublanes.
    h1 = jnp.dot(x, w1, preferred_element_type=jnp.float32) + b1_ref[...]
    h1 = jnp.maximum(h1, 0.0)                # [tb, H1] f32

    # Move batch onto lanes once.  (tb,128)->(128,tb): both dims are
    # (8,128)-aligned so this is the canonical XLU transpose; everything
    # downstream (fc2, fc3, sigmoid, store) is lane-dense in the batch dim.
    h1t = h1.T                               # [H1, tb]

    w2t = w2t_ref[...]                       # [H2, H1]
    if mxu_bf16:
        h1t = h1t.astype(jnp.bfloat16)
        w2t = w2t.astype(jnp.bfloat16)

    # fc2 + ReLU (MXU), batch on lanes.
    h2t = jnp.dot(w2t, h1t, preferred_element_type=jnp.float32) + b2c_ref[...]
    h2t = jnp.maximum(h2t, 0.0)              # [H2, tb] f32

    # fc3 (out_features = 1): VPU broadcast-multiply + sublane reduction
    # instead of a wasted 1-row MXU matmul; result is already lane-dense.
    z = jnp.sum(h2t * w3c_ref[...], axis=0, keepdims=True) + b3_ref[0, 0]  # [1, tb]

    # Sigmoid on the lane-dense row (EUP path), dense vector store.
    o_ref[...] = jax.nn.sigmoid(z)


def _auto_tile_b(B, D, H1, H2, vmem_budget_bytes=20 * 1024 * 1024):
    """Batch tile derived from the feature dim and a per-generation-safe VMEM
    budget (fits the v5e 16 MiB scoped default with the explicit 32 MiB limit,
    and well under v7x's 64 MiB physical)."""
    # Resident weights/biases (constant index_maps; conservatively assume the
    # pipeline double-buffers them).
    resident = 2 * 4 * (D * H1 + H1 + H2 * H1 + H2 + H2)
    # Per-batch-row VMEM: double-buffered x row, f32 h1 + h1^T + h2^T temps,
    # double-buffered lane-dense output element.
    per_row = 4 * (2 * D + 2 * H1 + H2 + 2)
    cap = (vmem_budget_bytes - resident) // max(per_row, 1)
    cap = max(128, (cap // 128) * 128)
    # Large enough to amortize the ~0.35 us/grid-step overhead, small enough
    # to keep >= ~4 grid steps so the parallel batch axis feeds both v7x TCs.
    want = _round_up(max(1, -(-B // 4)), 128)
    return max(128, min(cap, 4096, want))


def game_success_predictor(x, w1, b1, w2t, b2c, w3c, b3, *, tile_b=None,
                           mxu_bf16=False):
    """Fused GameSuccessPredictor forward.  x: [B, D] -> [B, 1] f32.

    Parameter layouts (chosen so the kernel needs no weight transposes):
      w1  : [D, 128]  (= torch fc1.weight.T)    b1 : [1, 128]
      w2t : [64, 128] (= torch fc2.weight)      b2c: [64, 1]
      w3c : [64, 1]   (= torch fc3.weight.T)    b3 : [1, 1]
    """
    B, D = x.shape
    H1 = w1.shape[1]
    H2 = w2t.shape[0]

    if tile_b is None:
        tb = _auto_tile_b(B, D, H1, H2)
    else:
        tb = max(128, _round_up(int(tile_b), 128))

    # No full-array padding: the ragged last tile is handled by Pallas (OOB
    # input rows are undefined but only produce output rows >= B, which are
    # sliced off below).  Only when the whole batch is smaller than one tile
    # do we pad that single tile so the block never exceeds the array extent.
    if B < tb:
        x = jnp.pad(x, ((0, tb - B), (0, 0)))
    nb = pl.cdiv(B, tb)
    n_rows = nb * tb

    flops = 2 * n_rows * (D * H1 + H1 * H2 + H2)
    bytes_accessed = (
        n_rows * D * x.dtype.itemsize + n_rows * 4
        + 4 * (w1.size + b1.size + w2t.size + b2c.size + w3c.size + b3.size)
    )

    kernel = functools.partial(_mlp_kernel, mxu_bf16=mxu_bf16)

    out = pl.pallas_call(
        kernel,
        out_shape=jax.ShapeDtypeStruct((nb, tb), jnp.float32),
        grid=(nb,),
        in_specs=[
            pl.BlockSpec((tb, D), lambda i: (i, 0)),      # x: streamed per tile
            pl.BlockSpec((D, H1), lambda i: (0, 0)),      # w1: resident
            pl.BlockSpec((1, H1), lambda i: (0, 0)),      # b1: resident
            pl.BlockSpec((H2, H1), lambda i: (0, 0)),     # w2^T: resident
            pl.BlockSpec((H2, 1), lambda i: (0, 0)),      # b2 column: resident
            pl.BlockSpec((H2, 1), lambda i: (0, 0)),      # w3 column: resident
            pl.BlockSpec(memory_space=pltpu.MemorySpace.SMEM),  # b3 scalar
        ],
        out_specs=pl.BlockSpec((1, tb), lambda i: (i, 0)),  # lane-dense output
        compiler_params=pltpu.CompilerParams(
            dimension_semantics=("parallel",),
            vmem_limit_bytes=32 * 1024 * 1024,
        ),
        cost_estimate=pl.CostEstimate(
            flops=flops, transcendentals=n_rows, bytes_accessed=bytes_accessed
        ),
    )(x, w1, b1, w2t, b2c, w3c, b3)

    # (nb, tb) lane-dense slab -> [B, 1] column (rows >= B are discarded).
    return out.reshape(n_rows, 1)[:B]


def init_params(key, input_dim):
    """PyTorch nn.Linear-style init (U[-1/sqrt(fan_in), 1/sqrt(fan_in)]),
    returned in the layouts the kernel consumes."""
    H1, H2 = 128, 64

    def linear(k, fan_in, fan_out):
        kw, kb = jax.random.split(k)
        bound = 1.0 / math.sqrt(fan_in)
        w = jax.random.uniform(kw, (fan_out, fan_in), jnp.float32, -bound, bound)
        b = jax.random.uniform(kb, (fan_out,), jnp.float32, -bound, bound)
        return w, b

    k1, k2, k3 = jax.random.split(key, 3)
    w1_t, b1_t = linear(k1, input_dim, H1)     # torch layout [out, in]
    w2_t, b2_t = linear(k2, H1, H2)
    w3_t, b3_t = linear(k3, H2, 1)

    w1 = w1_t.T                    # [D, 128]
    b1 = b1_t.reshape(1, H1)       # [1, 128]
    w2t = w2_t                     # [64, 128]  (torch orientation)
    b2c = b2_t.reshape(H2, 1)      # [64, 1]
    w3c = w3_t.reshape(H2, 1)      # [64, 1]
    b3 = b3_t.reshape(1, 1)        # [1, 1]
    return w1, b1, w2t, b2c, w3c, b3


def _reference(x, w1, b1, w2t, b2c, w3c, b3):
    h1 = jnp.maximum(x @ w1 + b1, 0.0)
    h2 = jnp.maximum(h1 @ w2t.T + b2c.T, 0.0)
    return jax.nn.sigmoid(h2 @ w3c + b3)


if __name__ == "__main__":
    key = jax.random.PRNGKey(0)
    B, input_dim = 8, 32

    key, kx = jax.random.split(key)
    x = jax.random.normal(kx, (B, input_dim), jnp.float32)
    params = init_params(key, input_dim)

    # Small batch: single (minimally padded) tile, lane-dense output path.
    out = jax.block_until_ready(game_success_predictor(x, *params))
    ref = _reference(x, *params)
    assert out.shape == (B, 1)
    assert jnp.allclose(out, ref, atol=1e-5, rtol=1e-5)

    # Multi-tile + ragged batch: exercises the grid, resident weights and the
    # partial tail tile (no full-array padding).
    key, kx2 = jax.random.split(key)
    B2 = 300
    x2 = jax.random.normal(kx2, (B2, input_dim), jnp.float32)
    out2 = jax.block_until_ready(game_success_predictor(x2, *params, tile_b=128))
    ref2 = _reference(x2, *params)
    assert out2.shape == (B2, 1)
    assert jnp.allclose(out2, ref2, atol=1e-5, rtol=1e-5)

    # bf16 MXU-input path (perf option; f32 accumulation) — looser tolerance.
    out3 = jax.block_until_ready(
        game_success_predictor(x2, *params, tile_b=128, mxu_bf16=True))
    assert out3.shape == (B2, 1)
    assert jnp.allclose(out3, ref2, atol=2e-2, rtol=2e-2)

    print("KERNEL_OK")
</pallas_src>

<mosaic_0001>
module attributes {stable_mosaic.version = 11 : i64} {
  func.func @_mlp_kernel(%arg0: i32, %arg1: memref<128x32xf32, #tpu.memory_space<vmem>>, %arg2: memref<32x128xf32, #tpu.memory_space<vmem>>, %arg3: memref<1x128xf32, #tpu.memory_space<vmem>>, %arg4: memref<64x128xf32, #tpu.memory_space<vmem>>, %arg5: memref<64x1xf32, #tpu.memory_space<vmem>>, %arg6: memref<64x1xf32, #tpu.memory_space<vmem>>, %arg7: memref<1x1xf32, #tpu.memory_space<smem>>, %arg8: memref<1x128xf32, #tpu.memory_space<vmem>>) attributes {dimension_semantics = [#tpu.dimension_semantics<parallel>], iteration_bounds = array<i64: 1>, scalar_prefetch = 0 : i64, scratch_operands = 0 : i64, tpu.core_type = #tpu.core_type<tc>, window_params = [{transform_indices = @transform_0, window_bounds = array<i64: 128, 32>}, {pipeline_mode = #tpu.pipeline_mode<synchronous>, transform_indices = @transform_1, window_bounds = array<i64: 32, 128>}, {pipeline_mode = #tpu.pipeline_mode<synchronous>, transform_indices = @transform_2, window_bounds = array<i64: 1, 128>}, {pipeline_mode = #tpu.pipeline_mode<synchronous>, transform_indices = @transform_3, window_bounds = array<i64: 64, 128>}, {pipeline_mode = #tpu.pipeline_mode<synchronous>, transform_indices = @transform_4, window_bounds = array<i64: 64, 1>}, {pipeline_mode = #tpu.pipeline_mode<synchronous>, transform_indices = @transform_5, window_bounds = array<i64: 64, 1>}, {transform_indices = @transform_6, window_bounds = array<i64: 1, 1>}, {transform_indices = @transform_7, window_bounds = array<i64: 1, 128>}]} {
    %c0 = arith.constant 0 : index
    %c0_0 = arith.constant 0 : index
    %0 = vector.load %arg1[%c0, %c0_0] : memref<128x32xf32, #tpu.memory_space<vmem>>, vector<128x32xf32>
    %c0_1 = arith.constant 0 : index
    %c0_2 = arith.constant 0 : index
    %1 = vector.load %arg2[%c0_1, %c0_2] : memref<32x128xf32, #tpu.memory_space<vmem>>, vector<32x128xf32>
    %cst = arith.constant dense<0.000000e+00> : vector<128x128xf32>
    %2 = tpu.matmul %0, %1, %cst {dimension_numbers = #tpu.dot_dimension_numbers<[1], [0], [0], [1], [0, 0, 1, 1], [], []>} : vector<128x32xf32>, vector<32x128xf32>, vector<128x128xf32> -> vector<128x128xf32>
    %c0_3 = arith.constant 0 : index
    %c0_4 = arith.constant 0 : index
    %3 = vector.load %arg3[%c0_3, %c0_4] : memref<1x128xf32, #tpu.memory_space<vmem>>, vector<1x128xf32>
    %4 = vector.broadcast %3 : vector<1x128xf32> to vector<128x128xf32>
    %5 = arith.addf %2, %4 : vector<128x128xf32>
    %cst_5 = arith.constant 0.000000e+00 : f32
    %6 = vector.broadcast %cst_5 : f32 to vector<128x128xf32>
    %7 = arith.maximumf %5, %6 : vector<128x128xf32>
    %8 = tpu.transpose %7, [1, 0] : vector<128x128xf32> -> vector<128x128xf32>
    %c0_6 = arith.constant 0 : index
    %c0_7 = arith.constant 0 : index
    %9 = vector.load %arg4[%c0_6, %c0_7] : memref<64x128xf32, #tpu.memory_space<vmem>>, vector<64x128xf32>
    %cst_8 = arith.constant dense<0.000000e+00> : vector<64x128xf32>
    %10 = tpu.matmul %9, %8, %cst_8 {dimension_numbers = #tpu.dot_dimension_numbers<[1], [0], [0], [1], [0, 0, 1, 1], [], []>} : vector<64x128xf32>, vector<128x128xf32>, vector<64x128xf32> -> vector<64x128xf32>
    %c0_9 = arith.constant 0 : index
    %c0_10 = arith.constant 0 : index
    %11 = vector.load %arg5[%c0_9, %c0_10] : memref<64x1xf32, #tpu.memory_space<vmem>>, vector<64x1xf32>
    %12 = vector.broadcast %11 : vector<64x1xf32> to vector<64x128xf32>
    %13 = arith.addf %10, %12 : vector<64x128xf32>
    %cst_11 = arith.constant 0.000000e+00 : f32
    %14 = vector.broadcast %cst_11 : f32 to vector<64x128xf32>
    %15 = arith.maximumf %13, %14 : vector<64x128xf32>
    %c0_12 = arith.constant 0 : index
    %c0_13 = arith.constant 0 : index
    %16 = vector.load %arg6[%c0_12, %c0_13] : memref<64x1xf32, #tpu.memory_space<vmem>>, vector<64x1xf32>
    %17 = vector.broadcast %16 : vector<64x1xf32> to vector<64x128xf32>
    %18 = arith.mulf %15, %17 : vector<64x128xf32>
    %cst_14 = arith.constant dense<0.000000e+00> : vector<128xf32>
    %19 = vector.multi_reduction <add>, %18, %cst_14 [0] : vector<64x128xf32> to vector<128xf32>
    %20 = vector.shape_cast %19 : vector<128xf32> to vector<1x128xf32>
    %c0_15 = arith.constant 0 : index
    %c0_16 = arith.constant 0 : index
    %21 = memref.load %arg7[%c0_15, %c0_16] : memref<1x1xf32, #tpu.memory_space<smem>>
    %22 = vector.broadcast %21 : f32 to vector<1x128xf32>
    %23 = arith.addf %20, %22 : vector<1x128xf32>
    %24 = arith.negf %23 : vector<1x128xf32>
    %25 = math.exp %24 : vector<1x128xf32>
    %cst_17 = arith.constant 1.000000e+00 : f32
    %26 = vector.broadcast %cst_17 : f32 to vector<1x128xf32>
    %27 = arith.addf %26, %25 : vector<1x128xf32>
    %28 = arith.divf %26, %27 : vector<1x128xf32>
    %c0_18 = arith.constant 0 : index
    %c0_19 = arith.constant 0 : index
    %29 = vector.load %arg8[%c0_18, %c0_19] : memref<1x128xf32, #tpu.memory_space<vmem>>, vector<1x128xf32>
    tpu.vector_store %arg8[%c0_18, %c0_19], %28 {strides = array<i32>} : memref<1x128xf32, #tpu.memory_space<vmem>>, vector<1x128xf32>,
    return
  }
  func.func @transform_0(%arg0: i32) -> (i32, i32) {
    %c0_i32 = arith.constant 0 : i32
    %c0_i32_0 = arith.constant 0 : i32
    return %arg0, %c0_i32 : i32, i32
  }
  func.func @transform_1(%arg0: i32) -> (i32, i32) {
    %c0_i32 = arith.constant 0 : i32
    %c0_i32_0 = arith.constant 0 : i32
    %c0_i32_1 = arith.constant 0 : i32
    return %c0_i32, %c0_i32_0 : i32, i32
  }
  func.func @transform_2(%arg0: i32) -> (i32, i32) {
    %c0_i32 = arith.constant 0 : i32
    %c0_i32_0 = arith.constant 0 : i32
    %c0_i32_1 = arith.constant 0 : i32
    return %c0_i32, %c0_i32_0 : i32, i32
  }
  func.func @transform_3(%arg0: i32) -> (i32, i32) {
    %c0_i32 = arith.constant 0 : i32
    %c0_i32_0 = arith.constant 0 : i32
    %c0_i32_1 = arith.constant 0 : i32
    return %c0_i32, %c0_i32_0 : i32, i32
  }
  func.func @transform_4(%arg0: i32) -> (i32, i32) {
    %c0_i32 = arith.constant 0 : i32
    %c0_i32_0 = arith.constant 0 : i32
    %c0_i32_1 = arith.constant 0 : i32
    return %c0_i32, %c0_i32_0 : i32, i32
  }
  func.func @transform_5(%arg0: i32) -> (i32, i32) {
    %c0_i32 = arith.constant 0 : i32
    %c0_i32_0 = arith.constant 0 : i32
    %c0_i32_1 = arith.constant 0 : i32
    return %c0_i32, %c0_i32_0 : i32, i32
  }
  func.func @transform_6(%arg0: i32) -> (i32, i32) {
    %c0_i32 = arith.constant 0 : i32
    %c0_i32_0 = arith.constant 0 : i32
    %c0_i32_1 = arith.constant 0 : i32
    return %c0_i32, %c0_i32_0 : i32, i32
  }
  func.func @transform_7(%arg0: i32) -> (i32, i32) {
    %c0_i32 = arith.constant 0 : i32
    %c0_i32_0 = arith.constant 0 : i32
    return %arg0, %c0_i32 : i32, i32
  }
}

</mosaic_0001>

<bundles_post_ra>
// kernel: tpu_custom_call.1
= control target key start
LH: loop header
LB: loop body
LE: loop exit
PB: predicated region body
PF: predicated region fallthrough
CT: control target
= control target key end

     0   :  { %vm55_vm0 = vcmask 261120   ;;  %s979_s0 = inlined_call_operand.vmem [shape: f32[128,32], index: 0, kind: input, shape index: {}]   ;;  %s980_s1 = inlined_call_operand.vmem [shape: f32[32,128], index: 1, kind: input, shape index: {}]   ;;  %s981_s2 = inlined_call_operand.vmem [shape: f32[1,128], index: 2, kind: input, shape index: {}]   ;;  %s982_s3 = inlined_call_operand.vmem [shape: f32[64,128], index: 3, kind: input, shape index: {}]   ;;  %s983_s4 = inlined_call_operand.vmem [shape: f32[64,1], index: 4, kind: input, shape index: {}]   ;;  %s984_s5 = inlined_call_operand.vmem [shape: f32[64,1], index: 5, kind: input, shape index: {}]   ;;  %s985_s6 = inlined_call_operand.<no memory space> [shape: f32[1,1], index: 6, kind: input, shape index: {}]   ;;  %s986_s7 = inlined_call_operand.hbm [shape: f32[1,128], index: 7, kind: output, shape index: {}]  }
   0x1   :  { %v44_v0 = vld [vmem:[%s980_s1] sm:$0xff]  ;;  %v45_v1 = vld [vmem:[%s980_s1 + $0x8] sm:$0xff]  ;;  %v46_v2 = vld [vmem:[%s980_s1 + $0x10] sm:$0xff] }
   0x2   :  { %v665_v3 = vpack.c.bf16 %v45_v1, %v44_v0  ;;  %v47_v4 = vld [vmem:[%s980_s1 + $0x18] sm:$0xff]  ;;  %v28_v5 = vld [vmem:[%s979_s0] sm:$0xff] }
   0x3   :  { %v669_v6 = vpack.c.bf16 %v47_v4, %v46_v2  ;;  %597 = vmatprep.mubr.msk.f32.mxu0 %vm55_vm0, %v28_v5 }
   0x4   :  { %666 = vmatprep.subr.bf16.mxu0 %v665_v3 }
   0x5   :  { %668 = vmatpush3.bf16.msra.mxu0 %v665_v3 }
   0x6   :  { %670 = vmatprep.subr.bf16.mxu0 %v669_v6 }
   0x7   :  { %13 = vsyncpa [#allocation4], 0  ;;  %v29_v7 = vld [vmem:[%s979_s0 + $0x8] sm:$0xff]  ;;  %v30_v8 = vld [vmem:[%s979_s0 + $0x10] sm:$0xff]  ;;  %v753_v26 = vmov 0   ;;  %s754_s1 = smov [#allocation3]  }
   0x8   :  { %v31_v9 = vld [vmem:[%s979_s0 + $0x18] sm:$0xff]  ;;  %v32_v10 = vld [vmem:[%s979_s0 + $0x20] sm:$0xff]  ;;  %v33_v11 = vld [vmem:[%s979_s0 + $0x28] sm:$0xff]  ;;  %723 = vset.pattern.permute.xlu0 %v753_v26  ;;  %724 = vset.pattern.permute.xlu1 %v753_v26  ;;  %s519_s15 = sshll.u32 %s754_s1, 4  ;;  %s520_s15 = int_to_ptr.vmem [resolvable:$true] %s519_s15 }
   0x9   :  { %672 = vmatpush3.bf16.msra.mxu0 %v669_v6  ;;  %v34_v12 = vld [vmem:[%s979_s0 + $0x30] sm:$0xff]  ;;  %v35_v13 = vld [vmem:[%s979_s0 + $0x38] sm:$0xff]  ;;  %v36_v14 = vld [vmem:[%s979_s0 + $0x40] sm:$0xff]  ;;  %s729_s16 = scalar_lea.vmem %s520_s15, 16  ;;  %s733_s17 = scalar_lea.vmem %s520_s15, 32 }
   0xa   :  { %v37_v15 = vld [vmem:[%s979_s0 + $0x48] sm:$0xff]  ;;  %v38_v16 = vld [vmem:[%s979_s0 + $0x50] sm:$0xff]  ;;  %v39_v17 = vld [vmem:[%s979_s0 + $0x58] sm:$0xff]  ;;  %p730_p0 = scmp.ne.s32.totalorder %s520_s15, %s729_s16  ;;  %p734_p1 = scmp.lt.s32.totalorder %s520_s15, %s520_s15 }
   0xb   :  { %v40_v18 = vld [vmem:[%s979_s0 + $0x60] sm:$0xff]  ;;  %v41_v19 = vld [vmem:[%s979_s0 + $0x68] sm:$0xff]  ;;  %v42_v20 = vld [vmem:[%s979_s0 + $0x70] sm:$0xff]  ;;  %p735_p2 = scmp.lt.s32.totalorder %s733_s17, %s729_s16 }
   0xc   :  { %598 = vmatmul.mubr.msk.f32.vlgmr.msra.gmra.mrb[0].mxu0 %vm55_vm0, %v29_v7  ;;  %v43_v21 = vld [vmem:[%s979_s0 + $0x78] sm:$0xff]  ;;  %v265_v22 = vld [vmem:[%s982_s3] sm:$0xff]  ;;  %v267_v23 = vld [vmem:[%s982_s3 + $0x10] sm:$0xff] }
   0xd   :  { %600 = vmatprep.mubr.msk.f32.mxu0 %vm55_vm0, %v30_v8  ;;  %656 = vmatprep.mubr.f32.mxu1 %v267_v23  ;;  %v273_v24 = vld [vmem:[%s983_s4] sm:$0xff]  ;;  %v275_v25 = vld [vmem:[%s983_s4 + $0x10] sm:$0xff]  ;;  %v274_v27 = vld [vmem:[%s983_s4 + $0x8] sm:$0xff]  ;;  %p736_p3 = por %p735_p2, %p734_p1 }
   0xe   :  { %283 = vperm.xlu0 %723, %v273_v24   ;;  %293 = vperm.xlu1 %724, %v275_v25   ;;  %v276_v28 = vld [vmem:[%s983_s4 + $0x18] sm:$0xff]  ;;  %v434_v29 = vld [vmem:[%s984_s5] sm:$0xff]  ;;  %v435_v30 = vld [vmem:[%s984_s5 + $0x8] sm:$0xff] }
   0xf   :  { %v277_v31 = vld [vmem:[%s983_s4 + $0x20] sm:$0xff]  ;;  %v436_v32 = vld [vmem:[%s984_s5 + $0x10] sm:$0xff]  ;;  %v278_v33 = vld [vmem:[%s983_s4 + $0x28] sm:$0xff]  ;;  %p737_p4 = pnand %p736_p3, %p730_p0 }
  0x10   :  { %601 = vmatmul.mubr.msk.f32.gmra.mrb[2].mxu0 %vm55_vm0, %v31_v9  ;;  %v437_v34 = vld [vmem:[%s984_s5 + $0x18] sm:$0xff]  ;;  %v279_v35 = vld [vmem:[%s983_s4 + $0x30] sm:$0xff]  ;;  %v438_v36 = vld [vmem:[%s984_s5 + $0x20] sm:$0xff] }
  0x11   :  { %603 = vmatprep.mubr.msk.f32.mxu0 %vm55_vm0, %v32_v10  ;;  %v280_v37 = vld [vmem:[%s983_s4 + $0x38] sm:$0xff]  ;;  %v439_v38 = vld [vmem:[%s984_s5 + $0x28] sm:$0xff]  ;;  %v440_v39 = vld [vmem:[%s984_s5 + $0x30] sm:$0xff] }
  0x12   :  { %288 = vperm.xlu0 %723, %v274_v27   ;;  %298 = vperm.xlu1 %724, %v276_v28   ;;  %v441_v40 = vld [vmem:[%s984_s5 + $0x38] sm:$0xff]  ;;  %v928_v41 = vld [vmem:[%s981_s2] ss:$0 sm:$0xff] }
  0x14   :  { %604 = vmatmul.mubr.msk.f32.gmra.mrb[4].mxu0 %vm55_vm0, %v33_v11 }
  0x15   :  { %606 = vmatprep.mubr.msk.f32.mxu0 %vm55_vm0, %v34_v12 }
  0x16   :  { %444 = vperm.xlu0 %723, %v434_v29   ;;  %449 = vperm.xlu1 %724, %v435_v30  }
  0x18   :  { %607 = vmatmul.mubr.msk.f32.gmra.mrb[6].mxu0 %vm55_vm0, %v35_v13 }
  0x19   :  { %609 = vmatprep.mubr.msk.f32.mxu0 %vm55_vm0, %v36_v14 }
  0x1a   :  { %303 = vperm.xlu0 %723, %v277_v31   ;;  %454 = vperm.xlu1 %724, %v436_v32  }
  0x1c   :  { %610 = vmatmul.mubr.msk.f32.gmra.mrb[8].mxu0 %vm55_vm0, %v37_v15 }
  0x1d   :  { %612 = vmatprep.mubr.msk.f32.mxu0 %vm55_vm0, %v38_v16 }
  0x1e   :  { %308 = vperm.xlu0 %723, %v278_v33   ;;  %459 = vperm.xlu1 %724, %v437_v34   ;;  %v266_v34 = vld [vmem:[%s982_s3 + $0x8] sm:$0xff] }
  0x20   :  { %613 = vmatmul.mubr.msk.f32.gmra.mrb[10].mxu0 %vm55_vm0, %v39_v17 }
  0x21   :  { %615 = vmatprep.mubr.msk.f32.mxu0 %vm55_vm0, %v40_v18 }
  0x22   :  { %313 = vperm.xlu0 %723, %v279_v35   ;;  %464 = vperm.xlu1 %724, %v438_v36   ;;  %v268_v35 = vld [vmem:[%s982_s3 + $0x18] sm:$0xff]  ;;  %v269_v36 = vld [vmem:[%s982_s3 + $0x20] sm:$0xff] }
  0x24   :  { %616 = vmatmul.mubr.msk.f32.gmra.mrb[12].mxu0 %vm55_vm0, %v41_v19 }
  0x25   :  { %618 = vmatprep.mubr.msk.f32.mxu0 %vm55_vm0, %v42_v20 }
  0x26   :  { %318 = vperm.xlu0 %723, %v280_v37   ;;  %469 = vperm.xlu1 %724, %v439_v38   ;;  %v270_v37 = vld [vmem:[%s982_s3 + $0x28] sm:$0xff]  ;;  %v271_v38 = vld [vmem:[%s982_s3 + $0x30] sm:$0xff] }
  0x28   :  { %619 = vmatmul.mubr.msk.f32.gmra.mrb[14].mxu0 %vm55_vm0, %v43_v21 }
  0x29   :  { %653 = vmatprep.mubr.f32.mxu0 %v265_v22 }
  0x2a   :  { %474 = vperm.xlu0 %723, %v440_v39   ;;  %479 = vperm.xlu1 %724, %v441_v40   ;;  %v272_v39 = vld [vmem:[%s982_s3 + $0x38] sm:$0xff] }
  0x8d   :  { %v284_v40 = vpop.permute.xlu0 %283 }
  0xdf   :  { %v599_v42 = vpop.f32.mrb[0].mxu0 }
  0xe0   :  { %v176_v43 = vadd.f32 %v599_v42, %v928_v41  ;;  %v170_v44 = vpop.f32.mrb[1].mxu0  ;;  %v289_v42 = vpop.permute.xlu0 %288 }
  0xe1   :  { %v171_v45 = vadd.f32 %v928_v41, %v170_v44 }
  0xe2   :  { %v250_v46 = vmax.f32 %v176_v43, 0.0 }
  0xe3   :  { %v249_v47 = vmax.f32 %v171_v45, 0.0  ;;  %v602_v48 = vpop.f32.mrb[2].mxu0 }
  0xe4   :  { %v186_v49 = vadd.f32 %v602_v48, %v928_v41  ;;  %v180_v50 = vpop.f32.mrb[3].mxu0  ;;  %v445_v44 = vpop.permute.xlu0 %444 }
  0xe5   :  { %v673_v51 = vpack.c.bf16 %v250_v46, %v249_v47  ;;  %v181_v52 = vadd.f32 %v928_v41, %v180_v50 }
  0xe6   :  { %v252_v53 = vmax.f32 %v186_v49, 0.0 }
  0xe7   :  { %v251_v54 = vmax.f32 %v181_v52, 0.0  ;;  %674 = vmatprep.subr.bf16.mxu0 %v673_v51  ;;  %705 = vmatprep.subr.bf16.mxu1 %v673_v51  ;;  %v605_v55 = vpop.f32.mrb[4].mxu0 }
  0xe8   :  { %676 = vmatpush3.bf16.xpose.msra.mxu0 %v673_v51  ;;  %713 = vmatpush3.bf16.xpose.msra.mxu1 %v673_v51  ;;  %v196_v56 = vadd.f32 %v605_v55, %v928_v41  ;;  %v190_v57 = vpop.f32.mrb[5].mxu0  ;;  %v304_v46 = vpop.permute.xlu0 %303 }
  0xe9   :  { %v677_v58 = vpack.c.bf16 %v252_v53, %v251_v54  ;;  %v191_v59 = vadd.f32 %v928_v41, %v190_v57 }
  0xea   :  { %v254_v60 = vmax.f32 %v196_v56, 0.0 }
  0xeb   :  { %678 = vmatprep.subr.bf16.mxu0 %v677_v58  ;;  %706 = vmatprep.subr.bf16.mxu1 %v677_v58  ;;  %v253_v61 = vmax.f32 %v191_v59, 0.0  ;;  %v608_v62 = vpop.f32.mrb[6].mxu0 }
  0xec   :  { %v206_v63 = vadd.f32 %v608_v62, %v928_v41  ;;  %v200_v0 = vpop.f32.mrb[7].mxu0  ;;  %v309_v48 = vpop.permute.xlu0 %308 }
  0xed   :  { %v681_v1 = vpack.c.bf16 %v254_v60, %v253_v61  ;;  %v201_v2 = vadd.f32 %v928_v41, %v200_v0 }
  0xee   :  { %v256_v3 = vmax.f32 %v206_v63, 0.0 }
  0xef   :  { %v255_v4 = vmax.f32 %v201_v2, 0.0  ;;  %v611_v5 = vpop.f32.mrb[8].mxu0 }
  0xf0   :  { %680 = vmatpush3.bf16.xpose.msra.mxu0 %v677_v58  ;;  %714 = vmatpush3.bf16.xpose.msra.mxu1 %v677_v58  ;;  %v216_v6 = vadd.f32 %v611_v5, %v928_v41  ;;  %v210_v7 = vpop.f32.mrb[9].mxu0  ;;  %v314_v58 = vpop.permute.xlu0 %313 }
  0xf1   :  { %682 = vmatprep.subr.bf16.mxu0 %v681_v1  ;;  %707 = vmatprep.subr.bf16.mxu1 %v681_v1  ;;  %v685_v8 = vpack.c.bf16 %v256_v3, %v255_v4  ;;  %v211_v9 = vadd.f32 %v928_v41, %v210_v7 }
  0xf2   :  { %v258_v10 = vmax.f32 %v216_v6, 0.0 }
  0xf3   :  { %v257_v11 = vmax.f32 %v211_v9, 0.0  ;;  %v614_v12 = vpop.f32.mrb[10].mxu0 }
  0xf4   :  { %v226_v13 = vadd.f32 %v614_v12, %v928_v41  ;;  %v220_v14 = vpop.f32.mrb[11].mxu0 }
  0xf5   :  { %v689_v15 = vpack.c.bf16 %v258_v10, %v257_v11  ;;  %v221_v16 = vadd.f32 %v928_v41, %v220_v14  ;;  %v319_v10 = vpop.permute.xlu0 %318 }
  0xf6   :  { %v260_v17 = vmax.f32 %v226_v13, 0.0 }
  0xf7   :  { %v259_v18 = vmax.f32 %v221_v16, 0.0  ;;  %v617_v19 = vpop.f32.mrb[12].mxu0 }
  0xf8   :  { %684 = vmatpush3.bf16.xpose.msra.mxu0 %v681_v1  ;;  %715 = vmatpush3.bf16.xpose.msra.mxu1 %v681_v1  ;;  %v236_v20 = vadd.f32 %v617_v19, %v928_v41  ;;  %v230_v21 = vpop.f32.mrb[13].mxu0 }
  0xf9   :  { %686 = vmatprep.subr.bf16.mxu0 %v685_v8  ;;  %708 = vmatprep.subr.bf16.mxu1 %v685_v8  ;;  %v693_v22 = vpack.c.bf16 %v260_v17, %v259_v18  ;;  %v231_v23 = vadd.f32 %v928_v41, %v230_v21 }
  0xfa   :  { %v262_v24 = vmax.f32 %v236_v20, 0.0 }
  0xfb   :  { %v261_v25 = vmax.f32 %v231_v23, 0.0  ;;  %v620_v26 = vpop.f32.mrb[14].mxu0 }
  0xfc   :  { %v246_v27 = vadd.f32 %v620_v26, %v928_v41  ;;  %v240_v28 = vpop.f32.mrb[15].mxu0 }
  0xfd   :  { %v697_v29 = vpack.c.bf16 %v262_v24, %v261_v25  ;;  %v241_v30 = vadd.f32 %v928_v41, %v240_v28  ;;  %v294_v41 = vpop.permute.xlu1 %293  ;;  %v475_v24 = vpop.permute.xlu0 %474 }
  0xfe   :  { %v264_v31 = vmax.f32 %v246_v27, 0.0 }
  0xff   :  { %v263_v32 = vmax.f32 %v241_v30, 0.0 }
 0x100   :  { %688 = vmatpush3.bf16.xpose.msra.mxu0 %v685_v8  ;;  %716 = vmatpush3.bf16.xpose.msra.mxu1 %v685_v8 }
 0x101   :  { %690 = vmatprep.subr.bf16.mxu0 %v689_v15  ;;  %709 = vmatprep.subr.bf16.mxu1 %v689_v15  ;;  %v701_v33 = vpack.c.bf16 %v264_v31, %v263_v32  ;;  %v299_v43 = vpop.permute.xlu1 %298 }
 0x105   :  { %v450_v45 = vpop.permute.xlu1 %449 }
 0x108   :  { %692 = vmatpush3.bf16.xpose.msra.mxu0 %v689_v15  ;;  %717 = vmatpush3.bf16.xpose.msra.mxu1 %v689_v15 }
 0x109   :  { %694 = vmatprep.subr.bf16.mxu0 %v693_v22  ;;  %710 = vmatprep.subr.bf16.mxu1 %v693_v22  ;;  %v455_v47 = vpop.permute.xlu1 %454 }
 0x10d   :  { %v460_v49 = vpop.permute.xlu1 %459 }
 0x110   :  { %696 = vmatpush3.bf16.xpose.msra.mxu0 %v693_v22  ;;  %718 = vmatpush3.bf16.xpose.msra.mxu1 %v693_v22 }
 0x111   :  { %698 = vmatprep.subr.bf16.mxu0 %v697_v29  ;;  %711 = vmatprep.subr.bf16.mxu1 %v697_v29  ;;  %v465_v63 = vpop.permute.xlu1 %464 }
 0x115   :  { %v470_v17 = vpop.permute.xlu1 %469 }
 0x118   :  { %700 = vmatpush3.bf16.xpose.msra.mxu0 %v697_v29  ;;  %719 = vmatpush3.bf16.xpose.msra.mxu1 %v697_v29 }
 0x119   :  { %702 = vmatprep.subr.bf16.mxu0 %v701_v33  ;;  %712 = vmatprep.subr.bf16.mxu1 %v701_v33  ;;  %v480_v27 = vpop.permute.xlu1 %479 }
 0x120   :  { %704 = vmatpush3.bf16.xpose.msra.mxu0 %v701_v33  ;;  %720 = vmatpush3.bf16.xpose.msra.mxu1 %v701_v33 }
 0x127   :  { %654 = vmatmul.mubr.f32.vlgmr.msra.gmra.mrb[16].mxu0 %v266_v34  ;;  %657 = vmatmul.mubr.f32.vlgmr.msra.gmra.mrb[0].mxu1 %v268_v35 }
 0x128   :  { %659 = vmatprep.mubr.f32.mxu1 %v269_v36  ;;  %v504_v36 = vstv %s985_s6 }
 0x12b   :  { %660 = vmatmul.mubr.f32.gmra.mrb[2].mxu1 %v270_v37 }
 0x12c   :  { %662 = vmatprep.mubr.f32.mxu1 %v271_v38 }
 0x12f   :  { %663 = vmatmul.mubr.f32.gmra.mrb[4].mxu1 %v272_v39 }
 0x1fa   :  { %v655_v50 = vpop.f32.mrb[16].mxu0  ;;  %v658_v51 = vpop.f32.mrb[0].mxu1 }
 0x1fb   :  { %v393_v52 = vadd.f32 %v655_v50, %v289_v42  ;;  %v403_v53 = vadd.f32 %v658_v51, %v299_v43  ;;  %v387_v54 = vpop.f32.mrb[17].mxu0  ;;  %v397_v55 = vpop.f32.mrb[1].mxu1 }
 0x1fc   :  { %v388_v56 = vadd.f32 %v387_v54, %v284_v40  ;;  %v398_v57 = vadd.f32 %v397_v55, %v294_v41 }
 0x1fd   :  { %v427_v59 = vmax.f32 %v393_v52, 0.0  ;;  %v429_v1 = vmax.f32 %v403_v53, 0.0 }
 0x1fe   :  { %v426_v60 = vmax.f32 %v388_v56, 0.0  ;;  %v428_v61 = vmax.f32 %v398_v57, 0.0  ;;  %v661_v62 = vpop.f32.mrb[2].mxu1 }
 0x1ff   :  { %v483_v0 = vmul.f32 %v450_v45, %v427_v59  ;;  %v407_v2 = vpop.f32.mrb[3].mxu1  ;;  %v413_v4 = vadd.f32 %v661_v62, %v309_v48  ;;  %v485_v11 = vmul.f32 %v460_v49, %v429_v1 }
 0x200   :  { %v482_v3 = vmul.f32 %v445_v44, %v426_v60  ;;  %v408_v5 = vadd.f32 %v407_v2, %v304_v46  ;;  %v484_v7 = vmul.f32 %v455_v47, %v428_v61 }
 0x201   :  { %v431_v14 = vmax.f32 %v413_v4, 0.0 }
 0x202   :  { %v490_v6 = vadd.f32 %v483_v0, %v482_v3  ;;  %v430_v8 = vmax.f32 %v408_v5, 0.0  ;;  %v664_v9 = vpop.f32.mrb[4].mxu1 }
 0x203   :  { %v417_v12 = vpop.f32.mrb[5].mxu1  ;;  %v423_v15 = vadd.f32 %v664_v9, %v319_v10  ;;  %v487_v21 = vmul.f32 %v470_v17, %v431_v14 }
 0x204   :  { %v491_v13 = vadd.f32 %v490_v6, %v484_v7  ;;  %v418_v16 = vadd.f32 %v417_v12, %v314_v58  ;;  %v486_v18 = vmul.f32 %v465_v63, %v430_v8 }
 0x205   :  { %v433_v23 = vmax.f32 %v423_v15, 0.0 }
 0x206   :  { %v492_v19 = vadd.f32 %v491_v13, %v485_v11  ;;  %v432_v20 = vmax.f32 %v418_v16, 0.0 }
 0x207   :  { %v489_v28 = vmul.f32 %v480_v27, %v433_v23 }
 0x208   :  { %v493_v22 = vadd.f32 %v492_v19, %v486_v18  ;;  %v488_v25 = vmul.f32 %v475_v24, %v432_v20 }
 0x20a   :  { %v494_v26 = vadd.f32 %v493_v22, %v487_v21 }
 0x20c   :  { %v495_v29 = vadd.f32 %v494_v26, %v488_v25 }
 0x20e   :  { %v496_v30 = vadd.f32 %v495_v29, %v489_v28 }
 0x210   :  { %v497_v31 = vrot.slane %v496_v30, 4 }
 0x212   :  { %v498_v32 = vadd.f32 %v497_v31, %v496_v30 }
 0x214   :  { %v499_v33 = vrot.slane %v498_v32, 2 }
 0x216   :  { %v500_v34 = vadd.f32 %v499_v33, %v498_v32 }
 0x218   :  { %v501_v35 = vrot.slane %v500_v34, 1 }
 0x21a   :  { %v502_v37 = vadd.f32 %v501_v35, %v500_v34 }
 0x21c   :  { %v505_v38 = vadd.f32 %v504_v36, %v502_v37 }
 0x21e   :  { %v544_v39 = vmul.f32 -1.442695, %v505_v38 }
 0x220   :  { %725 = vpow2.f32 %v544_v39 }
 0x22a   :  { %v726_v40 = vpop.eup %725 }
 0x22b   :  { %v509_v41 = vadd.f32 1.0, %v726_v40 }
 0x22d   :  { %727 = vrcp.f32 %v509_v41 }
 0x237   :  { %v728_v42 = vpop.eup %727 }
 0x238   :  { %512 = vst [vmem:[#allocation3] sm:$0x1] %v728_v42 }
 0x239   :  { %740 = shalt.err (!%p737_p4)
}
 0x23a   :  { %s741_s19 = scalar_lea.hbm %s986_s7, 16 }
 0x23b   :  { %p742_p5 = scmp.ne.s32.totalorder %s986_s7, %s741_s19  ;;  %p745_p6 = scmp.lt.u32.totalorder %s741_s19, %s986_s7 }
 0x23d   :  { %p747_p7 = pnand %p745_p6, %p742_p5 }
 0x23f   :  { %750 = shalt.err (!%p747_p7)
}
 0x240   :  { %522 = dma.vmem_to_hbm [thread:$0]  %s520_s15, 16, %s986_s7, [#allocation4]  }
 0x241   :  { %751 = dma.done.wait [#allocation4], 16  }
 0x242   :  { %752 = vsyncadd [#allocation4], 4294967280 }
 0x243   :  { %526 = vsyncpa [#allocation4], 1 }

</bundles_post_ra>
